<compile_context>
chip_gen: v7x
topology: tpu7x:2x2x1
jax: 0.10.0
libtpu: 0.0.40
codegen_flags: <defaults>
</compile_context>

<pallas_src>
import functools

import jax
import jax.numpy as jnp
from jax.experimental import pallas as pl
from jax.experimental.pallas import tpu as pltpu


def _round_up(x, m):
    return ((x + m - 1) // m) * m


def final_layer_kernel(x_ref, w_ref, b_ref, o_ref):
    # x_ref: (TM, H)       token tile (native dtype)
    # w_ref: (H, O_pad)    folded weight  gamma[:,None] * W^T  (native dtype)
    # b_ref: (1, O_pad) f32 folded bias   beta @ W^T + b
    # o_ref: (TM, O_pad)   output tile
    x = x_ref[...].astype(jnp.float32)

    # One-pass mean / variance: both cross-lane (XLU) reductions are issued
    # from x and x*x without serializing behind (x - mean).  Biased variance,
    # eps=1e-6 -- matches torch.nn.LayerNorm.
    mean = jnp.mean(x, axis=-1, keepdims=True)
    mean_sq = jnp.mean(x * x, axis=-1, keepdims=True)
    var = jnp.maximum(mean_sq - mean * mean, 0.0)
    inv = jax.lax.rsqrt(var + 1e-6)
    xn = (x - mean) * inv

    # MXU matmul: weight stays in its native dtype, accumulation in f32.
    y = jnp.dot(xn.astype(w_ref.dtype), w_ref[...],
                preferred_element_type=jnp.float32)
    o_ref[...] = (y + b_ref[...]).astype(o_ref.dtype)


def prepare_final_layer_params(gamma, beta, weight, bias):
    """One-time prep.  Folds the LayerNorm affine into the linear layer:
        y = ((x - mean) * inv) @ (gamma[:,None] * W^T) + (beta @ W^T + b)
    (all folding done in f32, weight cast back to its native dtype once),
    transposes W to (H, O) and zero-pads O to a multiple of 128 for
    lane-dense stores.  Returns (w_fold (H,O_pad), b_fold (1,O_pad) f32, O)."""
    O, H = weight.shape
    O_pad = max(128, _round_up(O, 128))

    w_t = weight.T.astype(jnp.float32)                         # (H, O)
    w_fold = gamma.astype(jnp.float32)[:, None] * w_t          # (H, O)
    b_fold = beta.astype(jnp.float32) @ w_t + bias.astype(jnp.float32)

    if O_pad != O:
        w_fold = jnp.pad(w_fold, ((0, 0), (0, O_pad - O)))
        b_fold = jnp.pad(b_fold, ((0, O_pad - O),))

    w_fold = w_fold.astype(weight.dtype)                       # MXU-native dtype
    b_fold = b_fold.reshape(1, O_pad).astype(jnp.float32)
    return w_fold, b_fold, O


@functools.partial(jax.jit, static_argnames=("O", "tm_max"))
def final_layer(x, w_fold, b_fold, *, O, tm_max=2048):
    """x: (B, N, H). Params as returned by prepare_final_layer_params.
    Returns (B, N, O)."""
    B, N, H = x.shape
    O_pad = w_fold.shape[1]
    tokens = B * N
    itm_x = jnp.dtype(x.dtype).itemsize
    itm_w = jnp.dtype(w_fold.dtype).itemsize

    # Generation-aware VMEM budget: 3/4 of physical VMEM per core
    # (v7x 64 MiB -> ~48 MiB; v5e/v6e 128 MiB -> ~96 MiB).
    try:
        vmem_cap = int(pltpu.get_tpu_info().vmem_capacity_bytes)
    except Exception:  # pragma: no cover - conservative fallback
        vmem_cap = 64 << 20
    budget = (vmem_cap * 3) // 4

    # Token tile: as large as the budget allows (<= tm_max), rounded to the
    # dtype's sublane packing (f32: 8, bf16: 16, int8/fp8: 32).
    pack = max(8, 32 // itm_x)
    resident = 2 * (H * O_pad * itm_w + O_pad * 4)   # weight + bias (2x bufs)
    per_row = 2 * (H + O_pad) * itm_x                # double-buffered x + out rows
    tm_fit = max(pack, (budget - resident) // per_row)
    tm = min(tm_max, tm_fit, _round_up(tokens, pack))
    tm = max(pack, (tm // pack) * pack)

    need = tm * per_row + resident
    vmem_limit = int(min(max(2 * need, 8 << 20), budget))

    # No token-axis padding: ragged last block is masked by Pallas.
    x2 = x.reshape(tokens, H)
    grid = (pl.cdiv(tokens, tm),)

    out2 = pl.pallas_call(
        final_layer_kernel,
        out_shape=jax.ShapeDtypeStruct((tokens, O_pad), x.dtype),
        grid_spec=pltpu.PrefetchScalarGridSpec(
            num_scalar_prefetch=0,
            grid=grid,
            in_specs=[
                pl.BlockSpec((tm, H), lambda i: (i, 0)),        # x tile
                pl.BlockSpec((H, O_pad), lambda i: (0, 0)),     # folded weight
                pl.BlockSpec((1, O_pad), lambda i: (0, 0)),     # folded bias
            ],
            out_specs=pl.BlockSpec((tm, O_pad), lambda i: (i, 0)),
        ),
        compiler_params=pltpu.CompilerParams(
            dimension_semantics=("parallel",),
            vmem_limit_bytes=vmem_limit),
        # TODO(synk): on v7x, shard this token grid axis across the 2 TensorCores
        # (pltpu.CORE_PARALLEL / pl.core_map) once the target generation is known;
        # plain "parallel" keeps the second core idle there.
        # TODO(synk): pipeline_mode=pl.Buffered(1) on the invariant weight/bias
        # specs would halve their VMEM footprint; kept off for broad jax-version
        # compatibility (their 2x copies are already counted in `need`).
    )(x2, w_fold, b_fold)

    # Lane slice 128 -> O and reshape back; no token slice needed anymore.
    return out2[:, :O].reshape(B, N, O)


def _reference(x, gamma, beta, weight, bias):
    x32 = x.astype(jnp.float32)
    mean = jnp.mean(x32, axis=-1, keepdims=True)
    var = jnp.mean((x32 - mean) ** 2, axis=-1, keepdims=True)
    xn = (x32 - mean) * jax.lax.rsqrt(var + 1e-6)
    xn = xn * gamma + beta
    return xn @ weight.T.astype(jnp.float32) + bias


if __name__ == "__main__":
    hidden_size = 32
    patch_size = 2
    out_channels = 4
    O = patch_size * patch_size * out_channels   # 16
    B, N = 2, 8

    key = jax.random.PRNGKey(0)
    kx, kw, kb = jax.random.split(key, 3)

    x = jax.random.normal(kx, (B, N, hidden_size), dtype=jnp.float32)

    # Deterministic parameter init (LayerNorm: ones/zeros; Linear: uniform like torch).
    gamma = jnp.ones((hidden_size,), dtype=jnp.float32)
    beta = jnp.zeros((hidden_size,), dtype=jnp.float32)
    bound = 1.0 / (hidden_size ** 0.5)
    weight = jax.random.uniform(kw, (O, hidden_size), minval=-bound, maxval=bound,
                                dtype=jnp.float32)
    bias = jax.random.uniform(kb, (O,), minval=-bound, maxval=bound,
                              dtype=jnp.float32)

    # One-time param prep (fold LN affine into the linear, transpose, pad O -> 128).
    w_fold, b_fold, O_out = prepare_final_layer_params(gamma, beta, weight, bias)

    out = final_layer(x, w_fold, b_fold, O=O_out)
    out = jax.block_until_ready(out)

    ref = _reference(x, gamma, beta, weight, bias)
    assert out.shape == (B, N, O)
    assert jnp.allclose(out, ref, atol=1e-4, rtol=1e-4), "mismatch vs reference"

    print("KERNEL_OK")
</pallas_src>

<mosaic_0001>
module attributes {stable_mosaic.version = 11 : i64} {
  func.func @final_layer_kernel(%arg0: i32, %arg1: memref<16x32xf32, #tpu.memory_space<vmem>>, %arg2: memref<32x128xf32, #tpu.memory_space<vmem>>, %arg3: memref<1x128xf32, #tpu.memory_space<vmem>>, %arg4: memref<16x128xf32, #tpu.memory_space<vmem>>) attributes {dimension_semantics = [#tpu.dimension_semantics<parallel>], iteration_bounds = array<i64: 1>, scalar_prefetch = 0 : i64, scratch_operands = 0 : i64, tpu.core_type = #tpu.core_type<tc>, window_params = [{transform_indices = @transform_0, window_bounds = array<i64: 16, 32>}, {pipeline_mode = #tpu.pipeline_mode<synchronous>, transform_indices = @transform_1, window_bounds = array<i64: 32, 128>}, {pipeline_mode = #tpu.pipeline_mode<synchronous>, transform_indices = @transform_2, window_bounds = array<i64: 1, 128>}, {transform_indices = @transform_3, window_bounds = array<i64: 16, 128>}]} {
    %c0 = arith.constant 0 : index
    %c0_0 = arith.constant 0 : index
    %0 = vector.load %arg1[%c0, %c0_0] : memref<16x32xf32, #tpu.memory_space<vmem>>, vector<16x32xf32>
    %cst = arith.constant dense<0.000000e+00> : vector<16xf32>
    %1 = vector.multi_reduction <add>, %0, %cst [1] : vector<16x32xf32> to vector<16xf32>
    %2 = vector.shape_cast %1 : vector<16xf32> to vector<16x1xf32>
    %cst_1 = arith.constant 3.200000e+01 : f32
    %3 = vector.broadcast %cst_1 : f32 to vector<16x1xf32>
    %4 = arith.divf %2, %3 : vector<16x1xf32>
    %5 = arith.mulf %0, %0 : vector<16x32xf32>
    %cst_2 = arith.constant dense<0.000000e+00> : vector<16xf32>
    %6 = vector.multi_reduction <add>, %5, %cst_2 [1] : vector<16x32xf32> to vector<16xf32>
    %7 = vector.shape_cast %6 : vector<16xf32> to vector<16x1xf32>
    %cst_3 = arith.constant 3.200000e+01 : f32
    %8 = vector.broadcast %cst_3 : f32 to vector<16x1xf32>
    %9 = arith.divf %7, %8 : vector<16x1xf32>
    %10 = arith.mulf %4, %4 : vector<16x1xf32>
    %11 = arith.subf %9, %10 : vector<16x1xf32>
    %cst_4 = arith.constant 0.000000e+00 : f32
    %12 = vector.broadcast %cst_4 : f32 to vector<16x1xf32>
    %13 = arith.maximumf %11, %12 : vector<16x1xf32>
    %cst_5 = arith.constant 9.99999997E-7 : f32
    %14 = vector.broadcast %cst_5 : f32 to vector<16x1xf32>
    %15 = arith.addf %13, %14 : vector<16x1xf32>
    %16 = math.rsqrt %15 : vector<16x1xf32>
    %17 = vector.broadcast %4 : vector<16x1xf32> to vector<16x32xf32>
    %18 = arith.subf %0, %17 : vector<16x32xf32>
    %19 = vector.broadcast %16 : vector<16x1xf32> to vector<16x32xf32>
    %20 = arith.mulf %18, %19 : vector<16x32xf32>
    %c0_6 = arith.constant 0 : index
    %c0_7 = arith.constant 0 : index
    %21 = vector.load %arg2[%c0_6, %c0_7] : memref<32x128xf32, #tpu.memory_space<vmem>>, vector<32x128xf32>
    %cst_8 = arith.constant dense<0.000000e+00> : vector<16x128xf32>
    %22 = tpu.matmul %20, %21, %cst_8 {dimension_numbers = #tpu.dot_dimension_numbers<[1], [0], [0], [1], [0, 0, 1, 1], [], []>} : vector<16x32xf32>, vector<32x128xf32>, vector<16x128xf32> -> vector<16x128xf32>
    %c0_9 = arith.constant 0 : index
    %c0_10 = arith.constant 0 : index
    %23 = vector.load %arg3[%c0_9, %c0_10] : memref<1x128xf32, #tpu.memory_space<vmem>>, vector<1x128xf32>
    %24 = vector.broadcast %23 : vector<1x128xf32> to vector<16x128xf32>
    %25 = arith.addf %22, %24 : vector<16x128xf32>
    %c0_11 = arith.constant 0 : index
    %c0_12 = arith.constant 0 : index
    %26 = vector.load %arg4[%c0_11, %c0_12] : memref<16x128xf32, #tpu.memory_space<vmem>>, vector<16x128xf32>
    tpu.vector_store %arg4[%c0_11, %c0_12], %25 {strides = array<i32>} : memref<16x128xf32, #tpu.memory_space<vmem>>, vector<16x128xf32>,
    return
  }
  func.func @transform_0(%arg0: i32) -> (i32, i32) {
    %c0_i32 = arith.constant 0 : i32
    %c0_i32_0 = arith.constant 0 : i32
    return %arg0, %c0_i32 : i32, i32
  }
  func.func @transform_1(%arg0: i32) -> (i32, i32) {
    %c0_i32 = arith.constant 0 : i32
    %c0_i32_0 = arith.constant 0 : i32
    %c0_i32_1 = arith.constant 0 : i32
    return %c0_i32, %c0_i32_0 : i32, i32
  }
  func.func @transform_2(%arg0: i32) -> (i32, i32) {
    %c0_i32 = arith.constant 0 : i32
    %c0_i32_0 = arith.constant 0 : i32
    %c0_i32_1 = arith.constant 0 : i32
    return %c0_i32, %c0_i32_0 : i32, i32
  }
  func.func @transform_3(%arg0: i32) -> (i32, i32) {
    %c0_i32 = arith.constant 0 : i32
    %c0_i32_0 = arith.constant 0 : i32
    return %arg0, %c0_i32 : i32, i32
  }
}

</mosaic_0001>

<bundles_post_ra>
// kernel: final_layer.1
= control target key start
LH: loop header
LB: loop body
LE: loop exit
PB: predicated region body
PF: predicated region fallthrough
CT: control target
= control target key end

     0   :  { %8 = vsyncpa [#allocation3], 0  ;;  %s325_s0 = inlined_call_operand.hbm [shape: f32[16,32], index: 0, kind: input, shape index: {}]   ;;  %s326_s1 = inlined_call_operand.hbm [shape: f32[32,128], index: 1, kind: input, shape index: {}]   ;;  %s327_s2 = inlined_call_operand.vmem [shape: f32[1,128], index: 2, kind: input, shape index: {}]   ;;  %s328_s3 = inlined_call_operand.vmem [shape: f32[16,128], index: 3, kind: output, shape index: {}]  }
   0x1   :  { %9 = vsyncpa [#allocation5], 0  ;;  %s262_s12 = smov [#allocation2]   ;;  %s214_s16 = scalar_lea.hbm %s325_s0, 256 }
   0x2   :  { %s15_s13 = sshll.u32 %s262_s12, 4  ;;  %p215_p0 = scmp.ne.s32.totalorder %s325_s0, %s214_s16  ;;  %s16_s13 = int_to_ptr.vmem [resolvable:$true] %s15_s13 }
   0x3   :  { %p218_p1 = scmp.lt.u32.totalorder %s214_s16, %s325_s0 }
   0x5   :  { %p220_p2 = pnand %p218_p1, %p215_p0 }
   0x7   :  { %223 = shalt.err (!%p220_p2)
}
   0x8   :  { %s224_s21 = scalar_lea.vmem %s16_s13, 256  ;;  %p229_p4 = scmp.lt.s32.totalorder %s16_s13, %s16_s13 }
   0x9   :  { %p225_p3 = scmp.ne.s32.totalorder %s16_s13, %s224_s21  ;;  %p230_p5 = scmp.lt.s32.totalorder %s224_s21, %s224_s21 }
   0xb   :  { %p231_p6 = por %p230_p5, %p229_p4 }
   0xd   :  { %p232_p7 = pnand %p231_p6, %p225_p3 }
   0xf   :  { %235 = shalt.err (!%p232_p7)
}
  0x10   :  { %s263_s22 = smov 128   ;;  %s264_s23 = smov 8  }
  0x11   :  { %21 = dma.hbm_to_vmem [thread:$0]  %s325_s0, 256, %s16_s13, [#allocation3], %s263_s22, %s263_s22, %s264_s23  }
  0x12   :  { %s265_s26 = smov [#allocation4]   ;;  %s236_s30 = scalar_lea.hbm %s326_s1, 512 }
  0x13   :  { %s27_s27 = sshll.u32 %s265_s26, 4  ;;  %p237_p8 = scmp.ne.s32.totalorder %s326_s1, %s236_s30  ;;  %s28_s27 = int_to_ptr.vmem [resolvable:$true] %s27_s27 }
  0x14   :  { %p240_p9 = scmp.lt.u32.totalorder %s236_s30, %s326_s1 }
  0x16   :  { %p242_p10 = pnand %p240_p9, %p237_p8 }
  0x18   :  { %245 = shalt.err (!%p242_p10)
}
  0x19   :  { %s246_s8 = scalar_lea.vmem %s28_s27, 512  ;;  %p251_p12 = scmp.lt.s32.totalorder %s28_s27, %s28_s27 }
  0x1a   :  { %p247_p11 = scmp.ne.s32.totalorder %s28_s27, %s246_s8  ;;  %p252_p13 = scmp.lt.s32.totalorder %s246_s8, %s246_s8 }
  0x1c   :  { %p253_p0 = por %p252_p13, %p251_p12 }
  0x1e   :  { %p254_p1 = pnand %p253_p0, %p247_p11 }
  0x20   :  { %257 = shalt.err (!%p254_p1)
}
  0x21   :  { %33 = dma.hbm_to_vmem [thread:$0]  %s326_s1, 512, %s28_s27, [#allocation5], %s263_s22, %s263_s22, %s264_s23  }
  0x22   :  { %258 = dma.done.wait [#allocation3], 256  }
  0x23   :  { %259 = vsyncadd [#allocation3], 4294967040 }
  0x24   :  { %260 = dma.done.wait [#allocation5], 512  }
  0x25   :  { %261 = vsyncadd [#allocation5], 4294966784  ;;  %vm44_vm0 = vcmask 261120   ;;  %v42_v0 = vld [vmem:[#allocation2] sm:$0xff]  ;;  %v43_v1 = vld [vmem:[#allocation2 + $0x8] sm:$0xff] }
  0x26   :  { %v45_v2 = vsel %vm44_vm0, %v42_v0, 0.0  ;;  %v54_v3 = vmul.f32 %v42_v0, %v42_v0  ;;  %v55_v4 = vmul.f32 %v43_v1, %v43_v1  ;;  %v48_v6 = vsel %vm44_vm0, %v43_v1, 0.0  ;;  %v78_v8 = vld [vmem:[#allocation4] sm:$0xff]  ;;  %v79_v9 = vld [vmem:[#allocation4 + $0x8] sm:$0xff]  ;;  %v80_v10 = vld [vmem:[#allocation4 + $0x10] sm:$0xff] }
  0x27   :  { %46 = vadd.xlane.f32.xlu0 %v45_v2  ;;  %v198_v11 = vpack.c.bf16 %v79_v9, %v78_v8  ;;  %v81_v12 = vld [vmem:[#allocation4 + $0x18] sm:$0xff]  ;;  %v178_v36 = vld [vmem:[%s327_s2] ss:$0 sm:$0xff] }
  0x28   :  { %v56_v5 = vsel %vm44_vm0, %v54_v3, 0.0  ;;  %v59_v7 = vsel %vm44_vm0, %v55_v4, 0.0  ;;  %v202_v13 = vpack.c.bf16 %v81_v12, %v80_v10 }
  0x29   :  { %57 = vadd.xlane.f32.xlu1 %v56_v5  ;;  %199 = vmatprep.subr.bf16.mxu0 %v198_v11 }
  0x2a   :  { %201 = vmatpush3.bf16.msra.mxu0 %v198_v11 }
  0x2b   :  { %49 = vadd.xlane.f32.xlu0 %v48_v6  ;;  %203 = vmatprep.subr.bf16.mxu0 %v202_v13 }
  0x2d   :  { %60 = vadd.xlane.f32.xlu1 %v59_v7 }
  0x2e   :  { %205 = vmatpush3.bf16.msra.mxu0 %v202_v13 }
  0xb4   :  { %v47_v14 = vpop.xlane.xlu0 %46 }
  0xb5   :  { %v52_v15 = vmul.f32 0.03125, %v47_v14 }
  0xb6   :  { %v58_v16 = vpop.xlane.xlu1 %57 }
  0xb7   :  { %v64_v17 = vmul.f32 %v52_v15, %v52_v15  ;;  %v62_v18 = vmul.f32 0.03125, %v58_v16  ;;  %v74_v30 = vsub.f32 %v42_v0, %v52_v15 }
  0xb8   :  { %v50_v19 = vpop.xlane.xlu0 %49 }
  0xb9   :  { %v66_v20 = vsub.f32 %v62_v18, %v64_v17  ;;  %v53_v21 = vmul.f32 0.03125, %v50_v19 }
  0xba   :  { %v61_v22 = vpop.xlane.xlu1 %60 }
  0xbb   :  { %v68_v23 = vmax.f32 %v66_v20, 0.0  ;;  %v65_v24 = vmul.f32 %v53_v21, %v53_v21  ;;  %v63_v25 = vmul.f32 0.03125, %v61_v22  ;;  %v75_v33 = vsub.f32 %v43_v1, %v53_v21 }
  0xbd   :  { %v70_v26 = vadd.f32 1e-06, %v68_v23  ;;  %v67_v27 = vsub.f32 %v63_v25, %v65_v24 }
  0xbf   :  { %210 = vrsqrt.f32 %v70_v26  ;;  %v69_v28 = vmax.f32 %v67_v27, 0.0 }
  0xc1   :  { %v71_v29 = vadd.f32 1e-06, %v69_v28 }
  0xc3   :  { %212 = vrsqrt.f32 %v71_v29 }
  0xc9   :  { %v211_v31 = vpop.eup %210 }
  0xca   :  { %v76_v32 = vmul.f32 %v211_v31, %v74_v30 }
  0xcc   :  { %195 = vmatprep.mubr.msk.f32.mxu0 %vm44_vm0, %v76_v32 }
  0xcd   :  { %v213_v34 = vpop.eup %212 }
  0xce   :  { %v77_v35 = vmul.f32 %v213_v34, %v75_v33 }
  0xd0   :  { %196 = vmatmul.mubr.msk.f32.vlgmr.msra.gmra.mrb[0].mxu0 %vm44_vm0, %v77_v35 }
 0x1a3   :  { %v197_v37 = vpop.f32.mrb[0].mxu0 }
 0x1a4   :  { %v167_v38 = vadd.f32 %v197_v37, %v178_v36  ;;  %v161_v39 = vpop.f32.mrb[1].mxu0 }
 0x1a5   :  { %v162_v40 = vadd.f32 %v178_v36, %v161_v39 }
 0x1a6   :  { %171 = vst [vmem:[%s328_s3 + $0x8] sm:$0xff] %v167_v38 }
 0x1a7   :  { %170 = vst [vmem:[%s328_s3] sm:$0xff] %v162_v40 }
 0x1a8   :  { %176 = vsyncpa [#allocation3], 1 }
 0x1a9   :  { %177 = vsyncpa [#allocation5], 1 }

</bundles_post_ra>
